<compile_context>
chip_gen: v7x
topology: tpu7x:2x2x1
jax: 0.10.0
libtpu: 0.0.40
codegen_flags: <defaults>
</compile_context>

<pallas_src>
import functools

import jax
import jax.numpy as jnp
from jax import lax
from jax.experimental import pallas as pl
from jax.experimental.pallas import tpu as pltpu


# dot_general dimension numbers for A @ B^T (contract both on their last dim).
_TRANS_RHS = (((1,), (1,)), ((), ()))


def _round_up(x, m):
    return -(-x // m) * m


def _sigmoid(x):
    # One EUP op (tanh) plus cheap VPU mul/add.  jax.nn.sigmoid may lower to
    # exp + divide (EUP + Newton steps); this keeps the kernel HBM-bound on
    # v7x where the EUP can otherwise become the binding unit.
    return 0.5 * (jnp.tanh(0.5 * x) + 1.0)


def _vpu_linear(w, b, h):
    """Tiny (out,in) @ (in,TB) + b as a rank-1 broadcast-FMA accumulation.

    Keeps the 8x16 / 1x8 trailing layers off the MXU: a 128x128 (v5e) /
    256x256 (v6e/v7x) systolic fill/drain on a strictly serial dependency
    chain is pure latency, while the VPU has slack in this HBM-bound kernel.
    """
    out_dim, in_dim = w.shape
    acc = jnp.broadcast_to(b, (out_dim, h.shape[1]))
    for k in range(in_dim):              # static unroll, in_dim <= 16 here
        acc = acc + w[:, k:k + 1] * h[k:k + 1, :]
    return acc


def _mlp_kernel(x1_ref, x2_ref,
                w1a_ref, w1b_ref, b1_ref,
                w2_ref, b2_ref,
                w3_ref, b3_ref,
                w4_ref, b4_ref,
                w5_ref, b5_ref,
                o_ref):
    """scene_discriminator MLP on one batch tile, computed feature-major.

    Weights are PyTorch (out, in); intermediates are (out, TB) with the
    batch on the lane axis, so no data transpose happens anywhere.
    """
    # Layer 1: sigmoid(W1a @ x1^T + W1b @ x2^T + b1) -> (P, TB).  The batch
    # transpose is folded into the MXU (transpose_rhs) and the (B, 2P)
    # concatenation is never materialized in HBM.
    h = lax.dot_general(w1a_ref[...], x1_ref[...], _TRANS_RHS,
                        preferred_element_type=jnp.float32)
    h = h + lax.dot_general(w1b_ref[...], x2_ref[...], _TRANS_RHS,
                            preferred_element_type=jnp.float32)
    h = _sigmoid(h + b1_ref[...])

    # Layers 2..5: (out, in) @ (in, TB); batch stays on the lanes.  The tiny
    # trailing layers go to the VPU instead of the MXU.
    for w_ref, b_ref in ((w2_ref, b2_ref), (w3_ref, b3_ref),
                         (w4_ref, b4_ref), (w5_ref, b5_ref)):
        w = w_ref[...]
        b = b_ref[...]
        if w.shape[0] * w.shape[1] <= 128:
            h = _sigmoid(_vpu_linear(w, b, h))
        else:
            h = _sigmoid(jnp.dot(w, h, preferred_element_type=jnp.float32) + b)

    o_ref[...] = h.astype(o_ref.dtype)          # (1, TB) lane-dense store


def init_params(key, pose_dim):
    """Deterministic init; weights PyTorch-style (out, in), biases (out,)."""
    dims = [pose_dim * 2, pose_dim, pose_dim // 2, pose_dim // 4,
            pose_dim // 8, 1]
    params = []
    for i in range(5):
        fan_in, fan_out = dims[i], dims[i + 1]
        key, kw, kb = jax.random.split(key, 3)
        bound = 1.0 / jnp.sqrt(fan_in)
        w = jax.random.uniform(kw, (fan_out, fan_in), jnp.float32,
                               minval=-bound, maxval=bound)
        b = jax.random.uniform(kb, (fan_out,), jnp.float32,
                               minval=-bound, maxval=bound)
        params.append((w, b))
    return params


def prepare_params(params, pose_dim):
    """One-time packing of PyTorch-layout params into kernel arguments.

    Splits W1 so the kernel consumes input1/input2 directly (the (B, 2P)
    concatenated tensor is never materialized in HBM) and reshapes biases to
    (out, 1) columns.  Hoisted out of the per-call jitted path.
    """
    (w1, b1), (w2, b2), (w3, b3), (w4, b4), (w5, b5) = params
    P = pose_dim
    return (w1[:, :P], w1[:, P:], b1.reshape(-1, 1),
            w2, b2.reshape(-1, 1),
            w3, b3.reshape(-1, 1),
            w4, b4.reshape(-1, 1),
            w5, b5.reshape(-1, 1))


@functools.partial(jax.jit, static_argnames=("pose_dim", "max_block_rows"))
def scene_discriminator_forward(input1, input2, kernel_params, pose_dim,
                                max_block_rows=2048):
    P = pose_dim
    assert P % 8 == 0, "pose_dim must be a multiple of 8"
    assert input1.shape == input2.shape and input1.shape[1] == P
    B = input1.shape[0]

    # Batch tile: as large as allowed (amortizes the ~0.35 us per-grid-step
    # overhead) but small enough that there are still ~8 grid steps so
    # v7x's two TensorCores keep software-pipelining.  No jnp.pad of the
    # inputs: the grid uses cdiv and Pallas handles the ragged last block.
    TB = max(128, min(_round_up(max_block_rows, 128),
                      _round_up(pl.cdiv(B, 8), 128)))
    n_tiles = pl.cdiv(B, TB)

    (w1a, w1b, b1, w2, b2, w3, b3, w4, b4, w5, b5) = kernel_params
    weight_args = [w1a, w1b, b1, w2, b2, w3, b3, w4, b4, w5, b5]

    x_spec = pl.BlockSpec((TB, P), lambda i: (i, 0))
    # Constant index_map => weights stay VMEM-resident; Mosaic skips re-DMA
    # for unchanged block indices across grid steps.
    resident = lambda a: pl.BlockSpec(a.shape, lambda i: (0, 0))
    in_specs = [x_spec, x_spec] + [resident(a) for a in weight_args]
    out_spec = pl.BlockSpec((1, TB), lambda i: (0, i))    # lane-dense output

    # Roofline bookkeeping.  NOTE: (B, P) f32 inputs with P < 128 are
    # lane-padded toward 128 in HBM, so real DMA traffic uses the padded
    # width -- accounted for here so the estimate is not understated.
    dims = [2 * P, P, P // 2, P // 4, P // 8, 1]
    P_pad = max(128, _round_up(P, 128))
    flops = 2 * B * sum(dims[i] * dims[i + 1] for i in range(5))
    transcendentals = B * sum(dims[1:])                    # one tanh / element
    weight_elems = sum(int(a.size) for a in weight_args)
    bytes_accessed = 4 * (2 * B * P_pad + B + weight_elems)

    # VMEM estimate: double-buffered x tiles (lane-padded), output row,
    # f32 intermediates, weights.  Explicit limit so v5e (16 MiB default
    # scoped VMEM) can use the same large-tile config as v6e/v7x; capped at
    # 64 MiB to stay within v7x's physical per-core VMEM.
    vmem_need = 4 * (2 * 2 * TB * P_pad + 2 * 8 * TB
                     + TB * sum(dims[1:]) + 4 * weight_elems)
    vmem_limit = int(min(max(2 * vmem_need, 32 << 20), 64 << 20))

    out_row = pl.pallas_call(
        _mlp_kernel,
        out_shape=jax.ShapeDtypeStruct((1, B), jnp.float32),
        grid=(n_tiles,),
        in_specs=in_specs,
        out_specs=out_spec,
        compiler_params=pltpu.CompilerParams(
            dimension_semantics=("parallel",),
            vmem_limit_bytes=vmem_limit),
        cost_estimate=pl.CostEstimate(
            flops=flops,
            transcendentals=transcendentals,
            bytes_accessed=bytes_accessed),
    )(input1, input2, *weight_args)

    return out_row.reshape(B, 1)


def _reference_forward(input1, input2, params, pose_dim):
    """Pure-JAX reference matching the PyTorch forward."""
    h = jnp.concatenate([input1, input2], axis=1).reshape(-1, pose_dim * 2)
    for (w, b) in params:
        h = jax.nn.sigmoid(h @ w.T + b)
    return h


if __name__ == "__main__":
    pose_dim = 64     # keeps pose_dim/8 an integer (=8)
    batch = 1000      # not a tile multiple -> ragged last block, 8 grid steps

    key = jax.random.PRNGKey(0)
    k1, k2, kp = jax.random.split(key, 3)
    input1 = jax.random.normal(k1, (batch, pose_dim), jnp.float32)
    input2 = jax.random.normal(k2, (batch, pose_dim), jnp.float32)
    params = init_params(kp, pose_dim)
    kernel_params = prepare_params(params, pose_dim)

    out = scene_discriminator_forward(input1, input2, kernel_params, pose_dim)
    out = jax.block_until_ready(out)

    ref = _reference_forward(input1, input2, params, pose_dim)
    assert out.shape == (batch, 1), out.shape
    err = float(jnp.max(jnp.abs(out - ref)))
    assert err < 5e-5, f"Pallas output mismatch vs reference, max abs err={err}"

    print("KERNEL_OK")
</pallas_src>

<mosaic_0001>
module attributes {stable_mosaic.version = 11 : i64} {
  func.func @_mlp_kernel(%arg0: i32, %arg1: memref<128x64xf32, #tpu.memory_space<vmem>>, %arg2: memref<128x64xf32, #tpu.memory_space<vmem>>, %arg3: memref<64x64xf32, #tpu.memory_space<vmem>>, %arg4: memref<64x64xf32, #tpu.memory_space<vmem>>, %arg5: memref<64x1xf32, #tpu.memory_space<vmem>>, %arg6: memref<32x64xf32, #tpu.memory_space<vmem>>, %arg7: memref<32x1xf32, #tpu.memory_space<vmem>>, %arg8: memref<16x32xf32, #tpu.memory_space<vmem>>, %arg9: memref<16x1xf32, #tpu.memory_space<vmem>>, %arg10: memref<8x16xf32, #tpu.memory_space<vmem>>, %arg11: memref<8x1xf32, #tpu.memory_space<vmem>>, %arg12: memref<1x8xf32, #tpu.memory_space<vmem>>, %arg13: memref<1x1xf32, #tpu.memory_space<vmem>>, %arg14: memref<1x128xf32, #tpu.memory_space<vmem>>) attributes {dimension_semantics = [#tpu.dimension_semantics<parallel>], iteration_bounds = array<i64: 8>, scalar_prefetch = 0 : i64, scratch_operands = 0 : i64, tpu.core_type = #tpu.core_type<tc>, window_params = [{transform_indices = @transform_0, window_bounds = array<i64: 128, 64>}, {transform_indices = @transform_1, window_bounds = array<i64: 128, 64>}, {pipeline_mode = #tpu.pipeline_mode<synchronous>, transform_indices = @transform_2, window_bounds = array<i64: 64, 64>}, {pipeline_mode = #tpu.pipeline_mode<synchronous>, transform_indices = @transform_3, window_bounds = array<i64: 64, 64>}, {pipeline_mode = #tpu.pipeline_mode<synchronous>, transform_indices = @transform_4, window_bounds = array<i64: 64, 1>}, {pipeline_mode = #tpu.pipeline_mode<synchronous>, transform_indices = @transform_5, window_bounds = array<i64: 32, 64>}, {pipeline_mode = #tpu.pipeline_mode<synchronous>, transform_indices = @transform_6, window_bounds = array<i64: 32, 1>}, {pipeline_mode = #tpu.pipeline_mode<synchronous>, transform_indices = @transform_7, window_bounds = array<i64: 16, 32>}, {pipeline_mode = #tpu.pipeline_mode<synchronous>, transform_indices = @transform_8, window_bounds = array<i64: 16, 1>}, {pipeline_mode = #tpu.pipeline_mode<synchronous>, transform_indices = @transform_9, window_bounds = array<i64: 8, 16>}, {pipeline_mode = #tpu.pipeline_mode<synchronous>, transform_indices = @transform_10, window_bounds = array<i64: 8, 1>}, {pipeline_mode = #tpu.pipeline_mode<synchronous>, transform_indices = @transform_11, window_bounds = array<i64: 1, 8>}, {pipeline_mode = #tpu.pipeline_mode<synchronous>, transform_indices = @transform_12, window_bounds = array<i64: 1, 1>}, {transform_indices = @transform_13, window_bounds = array<i64: 1, 128>}]} {
    %c0 = arith.constant 0 : index
    %c0_0 = arith.constant 0 : index
    %0 = vector.load %arg3[%c0, %c0_0] : memref<64x64xf32, #tpu.memory_space<vmem>>, vector<64x64xf32>
    %c0_1 = arith.constant 0 : index
    %c0_2 = arith.constant 0 : index
    %1 = vector.load %arg1[%c0_1, %c0_2] : memref<128x64xf32, #tpu.memory_space<vmem>>, vector<128x64xf32>
    %cst = arith.constant dense<0.000000e+00> : vector<64x128xf32>
    %2 = tpu.matmul %0, %1, %cst {dimension_numbers = #tpu.dot_dimension_numbers<[1], [1], [0], [0], [0, 0, 1, 0], [], []>} : vector<64x64xf32>, vector<128x64xf32>, vector<64x128xf32> -> vector<64x128xf32>
    %c0_3 = arith.constant 0 : index
    %c0_4 = arith.constant 0 : index
    %3 = vector.load %arg4[%c0_3, %c0_4] : memref<64x64xf32, #tpu.memory_space<vmem>>, vector<64x64xf32>
    %c0_5 = arith.constant 0 : index
    %c0_6 = arith.constant 0 : index
    %4 = vector.load %arg2[%c0_5, %c0_6] : memref<128x64xf32, #tpu.memory_space<vmem>>, vector<128x64xf32>
    %cst_7 = arith.constant dense<0.000000e+00> : vector<64x128xf32>
    %5 = tpu.matmul %3, %4, %cst_7 {dimension_numbers = #tpu.dot_dimension_numbers<[1], [1], [0], [0], [0, 0, 1, 0], [], []>} : vector<64x64xf32>, vector<128x64xf32>, vector<64x128xf32> -> vector<64x128xf32>
    %6 = arith.addf %2, %5 : vector<64x128xf32>
    %c0_8 = arith.constant 0 : index
    %c0_9 = arith.constant 0 : index
    %7 = vector.load %arg5[%c0_8, %c0_9] : memref<64x1xf32, #tpu.memory_space<vmem>>, vector<64x1xf32>
    %8 = vector.broadcast %7 : vector<64x1xf32> to vector<64x128xf32>
    %9 = arith.addf %6, %8 : vector<64x128xf32>
    %cst_10 = arith.constant 5.000000e-01 : f32
    %10 = vector.broadcast %cst_10 : f32 to vector<64x128xf32>
    %11 = arith.mulf %10, %9 : vector<64x128xf32>
    %12 = math.tanh %11 : vector<64x128xf32>
    %cst_11 = arith.constant 1.000000e+00 : f32
    %13 = vector.broadcast %cst_11 : f32 to vector<64x128xf32>
    %14 = arith.addf %12, %13 : vector<64x128xf32>
    %cst_12 = arith.constant 5.000000e-01 : f32
    %15 = vector.broadcast %cst_12 : f32 to vector<64x128xf32>
    %16 = arith.mulf %15, %14 : vector<64x128xf32>
    %c0_13 = arith.constant 0 : index
    %c0_14 = arith.constant 0 : index
    %17 = vector.load %arg6[%c0_13, %c0_14] : memref<32x64xf32, #tpu.memory_space<vmem>>, vector<32x64xf32>
    %c0_15 = arith.constant 0 : index
    %c0_16 = arith.constant 0 : index
    %18 = vector.load %arg7[%c0_15, %c0_16] : memref<32x1xf32, #tpu.memory_space<vmem>>, vector<32x1xf32>
    %cst_17 = arith.constant dense<0.000000e+00> : vector<32x128xf32>
    %19 = tpu.matmul %17, %16, %cst_17 {dimension_numbers = #tpu.dot_dimension_numbers<[1], [0], [0], [1], [0, 0, 1, 1], [], []>} : vector<32x64xf32>, vector<64x128xf32>, vector<32x128xf32> -> vector<32x128xf32>
    %20 = vector.broadcast %18 : vector<32x1xf32> to vector<32x128xf32>
    %21 = arith.addf %19, %20 : vector<32x128xf32>
    %cst_18 = arith.constant 5.000000e-01 : f32
    %22 = vector.broadcast %cst_18 : f32 to vector<32x128xf32>
    %23 = arith.mulf %22, %21 : vector<32x128xf32>
    %24 = math.tanh %23 : vector<32x128xf32>
    %cst_19 = arith.constant 1.000000e+00 : f32
    %25 = vector.broadcast %cst_19 : f32 to vector<32x128xf32>
    %26 = arith.addf %24, %25 : vector<32x128xf32>
    %cst_20 = arith.constant 5.000000e-01 : f32
    %27 = vector.broadcast %cst_20 : f32 to vector<32x128xf32>
    %28 = arith.mulf %27, %26 : vector<32x128xf32>
    %c0_21 = arith.constant 0 : index
    %c0_22 = arith.constant 0 : index
    %29 = vector.load %arg8[%c0_21, %c0_22] : memref<16x32xf32, #tpu.memory_space<vmem>>, vector<16x32xf32>
    %c0_23 = arith.constant 0 : index
    %c0_24 = arith.constant 0 : index
    %30 = vector.load %arg9[%c0_23, %c0_24] : memref<16x1xf32, #tpu.memory_space<vmem>>, vector<16x1xf32>
    %cst_25 = arith.constant dense<0.000000e+00> : vector<16x128xf32>
    %31 = tpu.matmul %29, %28, %cst_25 {dimension_numbers = #tpu.dot_dimension_numbers<[1], [0], [0], [1], [0, 0, 1, 1], [], []>} : vector<16x32xf32>, vector<32x128xf32>, vector<16x128xf32> -> vector<16x128xf32>
    %32 = vector.broadcast %30 : vector<16x1xf32> to vector<16x128xf32>
    %33 = arith.addf %31, %32 : vector<16x128xf32>
    %cst_26 = arith.constant 5.000000e-01 : f32
    %34 = vector.broadcast %cst_26 : f32 to vector<16x128xf32>
    %35 = arith.mulf %34, %33 : vector<16x128xf32>
    %36 = math.tanh %35 : vector<16x128xf32>
    %cst_27 = arith.constant 1.000000e+00 : f32
    %37 = vector.broadcast %cst_27 : f32 to vector<16x128xf32>
    %38 = arith.addf %36, %37 : vector<16x128xf32>
    %cst_28 = arith.constant 5.000000e-01 : f32
    %39 = vector.broadcast %cst_28 : f32 to vector<16x128xf32>
    %40 = arith.mulf %39, %38 : vector<16x128xf32>
    %c0_29 = arith.constant 0 : index
    %c0_30 = arith.constant 0 : index
    %41 = vector.load %arg10[%c0_29, %c0_30] : memref<8x16xf32, #tpu.memory_space<vmem>>, vector<8x16xf32>
    %c0_31 = arith.constant 0 : index
    %c0_32 = arith.constant 0 : index
    %42 = vector.load %arg11[%c0_31, %c0_32] : memref<8x1xf32, #tpu.memory_space<vmem>>, vector<8x1xf32>
    %43 = vector.shape_cast %42 : vector<8x1xf32> to vector<8x1xf32>
    %44 = vector.broadcast %43 : vector<8x1xf32> to vector<8x128xf32>
    %45 = vector.extract_strided_slice %41 {offsets = [0, 0], sizes = [8, 1], strides = [1, 1]} : vector<8x16xf32> to vector<8x1xf32>
    %46 = vector.extract_strided_slice %40 {offsets = [0, 0], sizes = [1, 128], strides = [1, 1]} : vector<16x128xf32> to vector<1x128xf32>
    %47 = vector.broadcast %45 : vector<8x1xf32> to vector<8x128xf32>
    %48 = vector.broadcast %46 : vector<1x128xf32> to vector<8x128xf32>
    %49 = arith.mulf %47, %48 : vector<8x128xf32>
    %50 = arith.addf %44, %49 : vector<8x128xf32>
    %51 = vector.extract_strided_slice %41 {offsets = [0, 1], sizes = [8, 1], strides = [1, 1]} : vector<8x16xf32> to vector<8x1xf32>
    %52 = vector.extract_strided_slice %40 {offsets = [1, 0], sizes = [1, 128], strides = [1, 1]} : vector<16x128xf32> to vector<1x128xf32>
    %53 = vector.broadcast %51 : vector<8x1xf32> to vector<8x128xf32>
    %54 = vector.broadcast %52 : vector<1x128xf32> to vector<8x128xf32>
    %55 = arith.mulf %53, %54 : vector<8x128xf32>
    %56 = arith.addf %50, %55 : vector<8x128xf32>
    %57 = vector.extract_strided_slice %41 {offsets = [0, 2], sizes = [8, 1], strides = [1, 1]} : vector<8x16xf32> to vector<8x1xf32>
    %58 = vector.extract_strided_slice %40 {offsets = [2, 0], sizes = [1, 128], strides = [1, 1]} : vector<16x128xf32> to vector<1x128xf32>
    %59 = vector.broadcast %57 : vector<8x1xf32> to vector<8x128xf32>
    %60 = vector.broadcast %58 : vector<1x128xf32> to vector<8x128xf32>
    %61 = arith.mulf %59, %60 : vector<8x128xf32>
    %62 = arith.addf %56, %61 : vector<8x128xf32>
    %63 = vector.extract_strided_slice %41 {offsets = [0, 3], sizes = [8, 1], strides = [1, 1]} : vector<8x16xf32> to vector<8x1xf32>
    %64 = vector.extract_strided_slice %40 {offsets = [3, 0], sizes = [1, 128], strides = [1, 1]} : vector<16x128xf32> to vector<1x128xf32>
    %65 = vector.broadcast %63 : vector<8x1xf32> to vector<8x128xf32>
    %66 = vector.broadcast %64 : vector<1x128xf32> to vector<8x128xf32>
    %67 = arith.mulf %65, %66 : vector<8x128xf32>
    %68 = arith.addf %62, %67 : vector<8x128xf32>
    %69 = vector.extract_strided_slice %41 {offsets = [0, 4], sizes = [8, 1], strides = [1, 1]} : vector<8x16xf32> to vector<8x1xf32>
    %70 = vector.extract_strided_slice %40 {offsets = [4, 0], sizes = [1, 128], strides = [1, 1]} : vector<16x128xf32> to vector<1x128xf32>
    %71 = vector.broadcast %69 : vector<8x1xf32> to vector<8x128xf32>
    %72 = vector.broadcast %70 : vector<1x128xf32> to vector<8x128xf32>
    %73 = arith.mulf %71, %72 : vector<8x128xf32>
    %74 = arith.addf %68, %73 : vector<8x128xf32>
    %75 = vector.extract_strided_slice %41 {offsets = [0, 5], sizes = [8, 1], strides = [1, 1]} : vector<8x16xf32> to vector<8x1xf32>
    %76 = vector.extract_strided_slice %40 {offsets = [5, 0], sizes = [1, 128], strides = [1, 1]} : vector<16x128xf32> to vector<1x128xf32>
    %77 = vector.broadcast %75 : vector<8x1xf32> to vector<8x128xf32>
    %78 = vector.broadcast %76 : vector<1x128xf32> to vector<8x128xf32>
    %79 = arith.mulf %77, %78 : vector<8x128xf32>
    %80 = arith.addf %74, %79 : vector<8x128xf32>
    %81 = vector.extract_strided_slice %41 {offsets = [0, 6], sizes = [8, 1], strides = [1, 1]} : vector<8x16xf32> to vector<8x1xf32>
    %82 = vector.extract_strided_slice %40 {offsets = [6, 0], sizes = [1, 128], strides = [1, 1]} : vector<16x128xf32> to vector<1x128xf32>
    %83 = vector.broadcast %81 : vector<8x1xf32> to vector<8x128xf32>
    %84 = vector.broadcast %82 : vector<1x128xf32> to vector<8x128xf32>
    %85 = arith.mulf %83, %84 : vector<8x128xf32>
    %86 = arith.addf %80, %85 : vector<8x128xf32>
    %87 = vector.extract_strided_slice %41 {offsets = [0, 7], sizes = [8, 1], strides = [1, 1]} : vector<8x16xf32> to vector<8x1xf32>
    %88 = vector.extract_strided_slice %40 {offsets = [7, 0], sizes = [1, 128], strides = [1, 1]} : vector<16x128xf32> to vector<1x128xf32>
    %89 = vector.broadcast %87 : vector<8x1xf32> to vector<8x128xf32>
    %90 = vector.broadcast %88 : vector<1x128xf32> to vector<8x128xf32>
    %91 = arith.mulf %89, %90 : vector<8x128xf32>
    %92 = arith.addf %86, %91 : vector<8x128xf32>
    %93 = vector.extract_strided_slice %41 {offsets = [0, 8], sizes = [8, 1], strides = [1, 1]} : vector<8x16xf32> to vector<8x1xf32>
    %94 = vector.extract_strided_slice %40 {offsets = [8, 0], sizes = [1, 128], strides = [1, 1]} : vector<16x128xf32> to vector<1x128xf32>
    %95 = vector.broadcast %93 : vector<8x1xf32> to vector<8x128xf32>
    %96 = vector.broadcast %94 : vector<1x128xf32> to vector<8x128xf32>
    %97 = arith.mulf %95, %96 : vector<8x128xf32>
    %98 = arith.addf %92, %97 : vector<8x128xf32>
    %99 = vector.extract_strided_slice %41 {offsets = [0, 9], sizes = [8, 1], strides = [1, 1]} : vector<8x16xf32> to vector<8x1xf32>
    %100 = vector.extract_strided_slice %40 {offsets = [9, 0], sizes = [1, 128], strides = [1, 1]} : vector<16x128xf32> to vector<1x128xf32>
    %101 = vector.broadcast %99 : vector<8x1xf32> to vector<8x128xf32>
    %102 = vector.broadcast %100 : vector<1x128xf32> to vector<8x128xf32>
    %103 = arith.mulf %101, %102 : vector<8x128xf32>
    %104 = arith.addf %98, %103 : vector<8x128xf32>
    %105 = vector.extract_strided_slice %41 {offsets = [0, 10], sizes = [8, 1], strides = [1, 1]} : vector<8x16xf32> to vector<8x1xf32>
    %106 = vector.extract_strided_slice %40 {offsets = [10, 0], sizes = [1, 128], strides = [1, 1]} : vector<16x128xf32> to vector<1x128xf32>
    %107 = vector.broadcast %105 : vector<8x1xf32> to vector<8x128xf32>
    %108 = vector.broadcast %106 : vector<1x128xf32> to vector<8x128xf32>
    %109 = arith.mulf %107, %108 : vector<8x128xf32>
    %110 = arith.addf %104, %109 : vector<8x128xf32>
    %111 = vector.extract_strided_slice %41 {offsets = [0, 11], sizes = [8, 1], strides = [1, 1]} : vector<8x16xf32> to vector<8x1xf32>
    %112 = vector.extract_strided_slice %40 {offsets = [11, 0], sizes = [1, 128], strides = [1, 1]} : vector<16x128xf32> to vector<1x128xf32>
    %113 = vector.broadcast %111 : vector<8x1xf32> to vector<8x128xf32>
    %114 = vector.broadcast %112 : vector<1x128xf32> to vector<8x128xf32>
    %115 = arith.mulf %113, %114 : vector<8x128xf32>
    %116 = arith.addf %110, %115 : vector<8x128xf32>
    %117 = vector.extract_strided_slice %41 {offsets = [0, 12], sizes = [8, 1], strides = [1, 1]} : vector<8x16xf32> to vector<8x1xf32>
    %118 = vector.extract_strided_slice %40 {offsets = [12, 0], sizes = [1, 128], strides = [1, 1]} : vector<16x128xf32> to vector<1x128xf32>
    %119 = vector.broadcast %117 : vector<8x1xf32> to vector<8x128xf32>
    %120 = vector.broadcast %118 : vector<1x128xf32> to vector<8x128xf32>
    %121 = arith.mulf %119, %120 : vector<8x128xf32>
    %122 = arith.addf %116, %121 : vector<8x128xf32>
    %123 = vector.extract_strided_slice %41 {offsets = [0, 13], sizes = [8, 1], strides = [1, 1]} : vector<8x16xf32> to vector<8x1xf32>
    %124 = vector.extract_strided_slice %40 {offsets = [13, 0], sizes = [1, 128], strides = [1, 1]} : vector<16x128xf32> to vector<1x128xf32>
    %125 = vector.broadcast %123 : vector<8x1xf32> to vector<8x128xf32>
    %126 = vector.broadcast %124 : vector<1x128xf32> to vector<8x128xf32>
    %127 = arith.mulf %125, %126 : vector<8x128xf32>
    %128 = arith.addf %122, %127 : vector<8x128xf32>
    %129 = vector.extract_strided_slice %41 {offsets = [0, 14], sizes = [8, 1], strides = [1, 1]} : vector<8x16xf32> to vector<8x1xf32>
    %130 = vector.extract_strided_slice %40 {offsets = [14, 0], sizes = [1, 128], strides = [1, 1]} : vector<16x128xf32> to vector<1x128xf32>
    %131 = vector.broadcast %129 : vector<8x1xf32> to vector<8x128xf32>
    %132 = vector.broadcast %130 : vector<1x128xf32> to vector<8x128xf32>
    %133 = arith.mulf %131, %132 : vector<8x128xf32>
    %134 = arith.addf %128, %133 : vector<8x128xf32>
    %135 = vector.extract_strided_slice %41 {offsets = [0, 15], sizes = [8, 1], strides = [1, 1]} : vector<8x16xf32> to vector<8x1xf32>
    %136 = vector.extract_strided_slice %40 {offsets = [15, 0], sizes = [1, 128], strides = [1, 1]} : vector<16x128xf32> to vector<1x128xf32>
    %137 = vector.broadcast %135 : vector<8x1xf32> to vector<8x128xf32>
    %138 = vector.broadcast %136 : vector<1x128xf32> to vector<8x128xf32>
    %139 = arith.mulf %137, %138 : vector<8x128xf32>
    %140 = arith.addf %134, %139 : vector<8x128xf32>
    %cst_33 = arith.constant 5.000000e-01 : f32
    %141 = vector.broadcast %cst_33 : f32 to vector<8x128xf32>
    %142 = arith.mulf %141, %140 : vector<8x128xf32>
    %143 = math.tanh %142 : vector<8x128xf32>
    %cst_34 = arith.constant 1.000000e+00 : f32
    %144 = vector.broadcast %cst_34 : f32 to vector<8x128xf32>
    %145 = arith.addf %143, %144 : vector<8x128xf32>
    %cst_35 = arith.constant 5.000000e-01 : f32
    %146 = vector.broadcast %cst_35 : f32 to vector<8x128xf32>
    %147 = arith.mulf %146, %145 : vector<8x128xf32>
    %c0_36 = arith.constant 0 : index
    %c0_37 = arith.constant 0 : index
    %148 = vector.load %arg12[%c0_36, %c0_37] : memref<1x8xf32, #tpu.memory_space<vmem>>, vector<1x8xf32>
    %c0_38 = arith.constant 0 : index
    %c0_39 = arith.constant 0 : index
    %149 = vector.load %arg13[%c0_38, %c0_39] : memref<1x1xf32, #tpu.memory_space<vmem>>, vector<1x1xf32>
    %150 = vector.shape_cast %149 : vector<1x1xf32> to vector<1x1xf32>
    %151 = vector.broadcast %150 : vector<1x1xf32> to vector<1x128xf32>
    %152 = vector.extract_strided_slice %148 {offsets = [0, 0], sizes = [1, 1], strides = [1, 1]} : vector<1x8xf32> to vector<1x1xf32>
    %153 = vector.extract_strided_slice %147 {offsets = [0, 0], sizes = [1, 128], strides = [1, 1]} : vector<8x128xf32> to vector<1x128xf32>
    %154 = vector.broadcast %152 : vector<1x1xf32> to vector<1x128xf32>
    %155 = arith.mulf %154, %153 : vector<1x128xf32>
    %156 = arith.addf %151, %155 : vector<1x128xf32>
    %157 = vector.extract_strided_slice %148 {offsets = [0, 1], sizes = [1, 1], strides = [1, 1]} : vector<1x8xf32> to vector<1x1xf32>
    %158 = vector.extract_strided_slice %147 {offsets = [1, 0], sizes = [1, 128], strides = [1, 1]} : vector<8x128xf32> to vector<1x128xf32>
    %159 = vector.broadcast %157 : vector<1x1xf32> to vector<1x128xf32>
    %160 = arith.mulf %159, %158 : vector<1x128xf32>
    %161 = arith.addf %156, %160 : vector<1x128xf32>
    %162 = vector.extract_strided_slice %148 {offsets = [0, 2], sizes = [1, 1], strides = [1, 1]} : vector<1x8xf32> to vector<1x1xf32>
    %163 = vector.extract_strided_slice %147 {offsets = [2, 0], sizes = [1, 128], strides = [1, 1]} : vector<8x128xf32> to vector<1x128xf32>
    %164 = vector.broadcast %162 : vector<1x1xf32> to vector<1x128xf32>
    %165 = arith.mulf %164, %163 : vector<1x128xf32>
    %166 = arith.addf %161, %165 : vector<1x128xf32>
    %167 = vector.extract_strided_slice %148 {offsets = [0, 3], sizes = [1, 1], strides = [1, 1]} : vector<1x8xf32> to vector<1x1xf32>
    %168 = vector.extract_strided_slice %147 {offsets = [3, 0], sizes = [1, 128], strides = [1, 1]} : vector<8x128xf32> to vector<1x128xf32>
    %169 = vector.broadcast %167 : vector<1x1xf32> to vector<1x128xf32>
    %170 = arith.mulf %169, %168 : vector<1x128xf32>
    %171 = arith.addf %166, %170 : vector<1x128xf32>
    %172 = vector.extract_strided_slice %148 {offsets = [0, 4], sizes = [1, 1], strides = [1, 1]} : vector<1x8xf32> to vector<1x1xf32>
    %173 = vector.extract_strided_slice %147 {offsets = [4, 0], sizes = [1, 128], strides = [1, 1]} : vector<8x128xf32> to vector<1x128xf32>
    %174 = vector.broadcast %172 : vector<1x1xf32> to vector<1x128xf32>
    %175 = arith.mulf %174, %173 : vector<1x128xf32>
    %176 = arith.addf %171, %175 : vector<1x128xf32>
    %177 = vector.extract_strided_slice %148 {offsets = [0, 5], sizes = [1, 1], strides = [1, 1]} : vector<1x8xf32> to vector<1x1xf32>
    %178 = vector.extract_strided_slice %147 {offsets = [5, 0], sizes = [1, 128], strides = [1, 1]} : vector<8x128xf32> to vector<1x128xf32>
    %179 = vector.broadcast %177 : vector<1x1xf32> to vector<1x128xf32>
    %180 = arith.mulf %179, %178 : vector<1x128xf32>
    %181 = arith.addf %176, %180 : vector<1x128xf32>
    %182 = vector.extract_strided_slice %148 {offsets = [0, 6], sizes = [1, 1], strides = [1, 1]} : vector<1x8xf32> to vector<1x1xf32>
    %183 = vector.extract_strided_slice %147 {offsets = [6, 0], sizes = [1, 128], strides = [1, 1]} : vector<8x128xf32> to vector<1x128xf32>
    %184 = vector.broadcast %182 : vector<1x1xf32> to vector<1x128xf32>
    %185 = arith.mulf %184, %183 : vector<1x128xf32>
    %186 = arith.addf %181, %185 : vector<1x128xf32>
    %187 = vector.extract_strided_slice %148 {offsets = [0, 7], sizes = [1, 1], strides = [1, 1]} : vector<1x8xf32> to vector<1x1xf32>
    %188 = vector.extract_strided_slice %147 {offsets = [7, 0], sizes = [1, 128], strides = [1, 1]} : vector<8x128xf32> to vector<1x128xf32>
    %189 = vector.broadcast %187 : vector<1x1xf32> to vector<1x128xf32>
    %190 = arith.mulf %189, %188 : vector<1x128xf32>
    %191 = arith.addf %186, %190 : vector<1x128xf32>
    %cst_40 = arith.constant 5.000000e-01 : f32
    %192 = vector.broadcast %cst_40 : f32 to vector<1x128xf32>
    %193 = arith.mulf %192, %191 : vector<1x128xf32>
    %194 = math.tanh %193 : vector<1x128xf32>
    %cst_41 = arith.constant 1.000000e+00 : f32
    %195 = vector.broadcast %cst_41 : f32 to vector<1x128xf32>
    %196 = arith.addf %194, %195 : vector<1x128xf32>
    %cst_42 = arith.constant 5.000000e-01 : f32
    %197 = vector.broadcast %cst_42 : f32 to vector<1x128xf32>
    %198 = arith.mulf %197, %196 : vector<1x128xf32>
    %c0_43 = arith.constant 0 : index
    %c0_44 = arith.constant 0 : index
    %199 = vector.load %arg14[%c0_43, %c0_44] : memref<1x128xf32, #tpu.memory_space<vmem>>, vector<1x128xf32>
    tpu.vector_store %arg14[%c0_43, %c0_44], %198 {strides = array<i32>} : memref<1x128xf32, #tpu.memory_space<vmem>>, vector<1x128xf32>,
    return
  }
  func.func @transform_0(%arg0: i32) -> (i32, i32) {
    %c0_i32 = arith.constant 0 : i32
    %c0_i32_0 = arith.constant 0 : i32
    return %arg0, %c0_i32 : i32, i32
  }
  func.func @transform_1(%arg0: i32) -> (i32, i32) {
    %c0_i32 = arith.constant 0 : i32
    %c0_i32_0 = arith.constant 0 : i32
    return %arg0, %c0_i32 : i32, i32
  }
  func.func @transform_2(%arg0: i32) -> (i32, i32) {
    %c0_i32 = arith.constant 0 : i32
    %c0_i32_0 = arith.constant 0 : i32
    %c0_i32_1 = arith.constant 0 : i32
    return %c0_i32, %c0_i32_0 : i32, i32
  }
  func.func @transform_3(%arg0: i32) -> (i32, i32) {
    %c0_i32 = arith.constant 0 : i32
    %c0_i32_0 = arith.constant 0 : i32
    %c0_i32_1 = arith.constant 0 : i32
    return %c0_i32, %c0_i32_0 : i32, i32
  }
  func.func @transform_4(%arg0: i32) -> (i32, i32) {
    %c0_i32 = arith.constant 0 : i32
    %c0_i32_0 = arith.constant 0 : i32
    %c0_i32_1 = arith.constant 0 : i32
    return %c0_i32, %c0_i32_0 : i32, i32
  }
  func.func @transform_5(%arg0: i32) -> (i32, i32) {
    %c0_i32 = arith.constant 0 : i32
    %c0_i32_0 = arith.constant 0 : i32
    %c0_i32_1 = arith.constant 0 : i32
    return %c0_i32, %c0_i32_0 : i32, i32
  }
  func.func @transform_6(%arg0: i32) -> (i32, i32) {
    %c0_i32 = arith.constant 0 : i32
    %c0_i32_0 = arith.constant 0 : i32
    %c0_i32_1 = arith.constant 0 : i32
    return %c0_i32, %c0_i32_0 : i32, i32
  }
  func.func @transform_7(%arg0: i32) -> (i32, i32) {
    %c0_i32 = arith.constant 0 : i32
    %c0_i32_0 = arith.constant 0 : i32
    %c0_i32_1 = arith.constant 0 : i32
    return %c0_i32, %c0_i32_0 : i32, i32
  }
  func.func @transform_8(%arg0: i32) -> (i32, i32) {
    %c0_i32 = arith.constant 0 : i32
    %c0_i32_0 = arith.constant 0 : i32
    %c0_i32_1 = arith.constant 0 : i32
    return %c0_i32, %c0_i32_0 : i32, i32
  }
  func.func @transform_9(%arg0: i32) -> (i32, i32) {
    %c0_i32 = arith.constant 0 : i32
    %c0_i32_0 = arith.constant 0 : i32
    %c0_i32_1 = arith.constant 0 : i32
    return %c0_i32, %c0_i32_0 : i32, i32
  }
  func.func @transform_10(%arg0: i32) -> (i32, i32) {
    %c0_i32 = arith.constant 0 : i32
    %c0_i32_0 = arith.constant 0 : i32
    %c0_i32_1 = arith.constant 0 : i32
    return %c0_i32, %c0_i32_0 : i32, i32
  }
  func.func @transform_11(%arg0: i32) -> (i32, i32) {
    %c0_i32 = arith.constant 0 : i32
    %c0_i32_0 = arith.constant 0 : i32
    %c0_i32_1 = arith.constant 0 : i32
    return %c0_i32, %c0_i32_0 : i32, i32
  }
  func.func @transform_12(%arg0: i32) -> (i32, i32) {
    %c0_i32 = arith.constant 0 : i32
    %c0_i32_0 = arith.constant 0 : i32
    %c0_i32_1 = arith.constant 0 : i32
    return %c0_i32, %c0_i32_0 : i32, i32
  }
  func.func @transform_13(%arg0: i32) -> (i32, i32) {
    %c0_i32 = arith.constant 0 : i32
    %c0_i32_0 = arith.constant 0 : i32
    return %c0_i32, %arg0 : i32, i32
  }
}

</mosaic_0001>

<bundles_post_ra>
// kernel: scene_discriminator_forward.1
= control target key start
LH: loop header
LB: loop body
LE: loop exit
PB: predicated region body
PF: predicated region fallthrough
CT: control target
= control target key end

     0   :  { %s2650_s0 = inlined_call_operand.vmem [shape: f32[1000,64], index: 0, kind: input, shape index: {}]   ;;  %s2651_s1 = inlined_call_operand.vmem [shape: f32[1000,64], index: 1, kind: input, shape index: {}]   ;;  %s2652_s2 = inlined_call_operand.vmem [shape: f32[64,64], index: 2, kind: input, shape index: {}]   ;;  %s2653_s3 = inlined_call_operand.vmem [shape: f32[64,64], index: 3, kind: input, shape index: {}]   ;;  %s2654_s4 = inlined_call_operand.vmem [shape: f32[64,1], index: 4, kind: input, shape index: {}]   ;;  %s2655_s5 = inlined_call_operand.vmem [shape: f32[32,64], index: 5, kind: input, shape index: {}]   ;;  %s2656_s6 = inlined_call_operand.vmem [shape: f32[32,1], index: 6, kind: input, shape index: {}]   ;;  %s2657_s7 = inlined_call_operand.vmem [shape: f32[16,32], index: 7, kind: input, shape index: {}]   ;;  %s2658_s8 = inlined_call_operand.vmem [shape: f32[16,1], index: 8, kind: input, shape index: {}]   ;;  %s2659_s9 = inlined_call_operand.vmem [shape: f32[8,16], index: 9, kind: input, shape index: {}]   ;;  %s2660_s10 = inlined_call_operand.vmem [shape: f32[8,1], index: 10, kind: input, shape index: {}]   ;;  %s2661_s11 = inlined_call_operand.vmem [shape: f32[1,8], index: 11, kind: input, shape index: {}]   ;;  %s2662_s12 = inlined_call_operand.<no memory space> [shape: f32[1,1], index: 12, kind: input, shape index: {}]   ;;  %s2663_s13 = inlined_call_operand.hbm [shape: f32[1,1000], index: 13, kind: output, shape index: {}]  }
   0x1   :  { %2664 = sst [smem:[#allocation6_spill]] %s2650_s0  ;;  %v18_v0 = vstv %s2662_s12 }
   0x2   :  { %2665 = sst [smem:[#allocation7_spill]] %s2651_s1  ;;  %19 = vst [vmem:[#allocation2] sm:$0x1] %v18_v0 }
   0x3   :  { %20 = vsyncpa [#allocation4], 0 }
   0x4   :  { %22 = vsyncpa [#allocation4 + $0x1], 0  ;;  %s2258_s27 = smov 0   ;;  %s2260_s28 = smov 0  }
   0x5   :  { %s2262_s29 = smov 0   ;;  %s2264_s30 = smov 0  }
   0x6 LB: > { %s1609_s12 = sadd.s32 4294967295, %s2166_s30   ;;  %s1610_s14 = sadd.s32 4294967294, %s2166_s30   ;;  %s2166_s30 = sphi %s2264_s30, %s2675_s30   ;;  %s2162_s29 = sphi %s2262_s29, %s2674_s29   ;;  %s2158_s28 = sphi %s2260_s28, %s2673_s28   ;;  %s2154_s27 = sphi %s2258_s27, %s2672_s27  }
   0x7   : > { %s2281_s15 = sadd.s32 1, %s2166_s30   ;;  %s318_s16 = sadd.s32 1, %s2162_s29 }
   0x8   : > { %s315_s17 = ssub.s32 %s2166_s30, %s2281_s15  ;;  %p328_p0 = scmp.ne.s32.totalorder %s2162_s29, %s2158_s28 }
   0x9   : > { %p316_p1 = scmp.eq.s32.totalorder %s315_s17, 0  ;;  %p329_p2 = scmp.eq.s32.totalorder %s1609_s12, 7 }
   0xa   : > { %p334_p3 = scmp.ne.s32.totalorder %s2158_s28, %s2154_s27  ;;  %p335_p4 = scmp.eq.s32.totalorder %s1610_s14, 7 }
   0xb   : > { %s2291_s18 = scalar_select %p316_p1, %s2162_s29, %s318_s16  }
   0xc   : > { %p2293_p5 = por %p329_p2, %p328_p0  ;;  %p2297_p6 = por %p335_p4, %p334_p3 }
   0xd   : > { %p1613_p7 = scmp.ge.s32.totalorder %s2166_s30, 1  ;;  %p420_p8 = scmp.lt.s32.totalorder %s2166_s30, 9 }
   0xf   : > { %p421_p9 = pnand %p1613_p7, %p420_p8 }
  0x10   : > { %s2303_s21 = sshll.u32 (!%p421_p9), %s1609_s12, 4  ;;  %vm552_vm0 = vcmask (!%p421_p9), 523264   ;;  %v528_v1 = vld [vmem:[%s2653_s3] sm:$0xff] (!%p421_p9)  ;;  %v2168_v3 = vmov (!%p421_p9), 0   ;;  %s2668_s1 = sld [smem:[#allocation7_spill]] (!%p421_p9)  ;;  %v909_v6 = vld [vmem:[%s2654_s4 + $0x10] sm:$0xff] (!%p421_p9) }
  0x11   : > { %424 = sbr.rel (%p421_p9) target bundleno = 924 (0x39c), region = 72  ;;  %v504_v2 = vld [vmem:[%s2652_s2] sm:$0xff] (!%p421_p9)  ;;  %p481_p10 = scmp.lt.s32.totalorder (!%p421_p9), %s2303_s21, 124  ;;  %1773 = vmatprep.mubr.msk.f32.mxu1 (!%p421_p9), %vm552_vm0, %v528_v1  ;;  %2045 = vset.pattern.permute.xlu0 (!%p421_p9), %v2168_v3  ;;  %vm2327_vm1 = vmpackc.low (!%p421_p9), %vm552_vm0, %vm552_vm0  ;;  %v908_v7 = vld [vmem:[%s2654_s4 + $0x8] sm:$0xff] (!%p421_p9)  ;;  %vm1150_vm2 = vcmask (!%p421_p9), 261120  }
  0x12   : > { %1817 = vmatprep.mubr.msk.f32.mxu0 (!%p421_p9), %vm552_vm0, %v504_v2  ;;  %2046 = vset.pattern.permute.xlu1 (!%p421_p9), %v2168_v3  ;;  %v907_v4 = vld [vmem:[%s2654_s4] sm:$0xff] (!%p421_p9)  ;;  %s2671_s0 = sld [smem:[#allocation6_spill]] (!%p421_p9)  ;;  %v910_v20 = vld [vmem:[%s2654_s4 + $0x18] sm:$0xff] (!%p421_p9)  ;;  %v912_v28 = vld [vmem:[%s2654_s4 + $0x28] sm:$0xff] (!%p421_p9)  ;;  %s474_s25 = sand.u32 (!%p421_p9), 1, %s2158_s28  }
  0x13   : > { %917 = vperm.xlu0 (!%p421_p9), %2045, %v907_v4   ;;  %927 = vperm.xlu1 (!%p421_p9), %2046, %v909_v6   ;;  %v911_v27 = vld [vmem:[%s2654_s4 + $0x20] sm:$0xff] (!%p421_p9)  ;;  %v913_v29 = vld [vmem:[%s2654_s4 + $0x30] sm:$0xff] (!%p421_p9)  ;;  %v914_v30 = vld [vmem:[%s2654_s4 + $0x38] sm:$0xff] (!%p421_p9)  ;;  %s475_s14 = scalar_lea.vmem (!%p421_p9), [#allocation3], %s474_s25  ;;  %s2608_s17 = scalar_lea.hbm (!%p421_p9), %s2663_s13, %s2303_s21 }
  0x14   : > { %v999_v35 = vld [vmem:[%s2656_s6] sm:$0xff] (!%p421_p9)  ;;  %v1000_v37 = vld [vmem:[%s2656_s6 + $0x8] sm:$0xff] (!%p421_p9)  ;;  %v1001_v39 = vld [vmem:[%s2656_s6 + $0x10] sm:$0xff] (!%p421_p9)  ;;  %s1543_s16 = sshll.u32 (!%p421_p9), %s475_s14, 4  ;;  %s1531_s22 = scalar_lea.sflag (!%p421_p9), [#allocation4], %s474_s25  ;;  %s2610_s16 = int_to_ptr.vmem [resolvable:$true] %s1543_s16 }
  0x15   : > { %v1002_v40 = vld [vmem:[%s2656_s6 + $0x18] sm:$0xff] (!%p421_p9)  ;;  %v1138_v45 = vld [vmem:[%s2658_s8] sm:$0xff] (!%p421_p9)  ;;  %v1139_v47 = vld [vmem:[%s2658_s8 + $0x8] sm:$0xff] (!%p421_p9)  ;;  %s2184_s24 = smov (!%p421_p9), [#allocation3]  }
  0x16   : > { %v2428_v49 = vld [vmem:[%s2659_s9] sm:$0xff] (!%p421_p9)  ;;  %v531_v5 = vld [vmem:[%s2653_s3 + $0x18] sm:$0xff] (!%p421_p9) }
  0x17   : > { %922 = vperm.xlu0 (!%p421_p9), %2045, %v908_v7   ;;  %932 = vperm.xlu1 (!%p421_p9), %2046, %v910_v20   ;;  %v1241_v50 = vld [vmem:[%s2660_s10] sm:$0xff] (!%p421_p9)  ;;  %v529_v7 = vld [vmem:[%s2653_s3 + $0x8] sm:$0xff] (!%p421_p9) }
  0x18   : > { %s482_s26 = scalar_select %p481_p10, %s2303_s21, 124  ;;  %v995_v20 = vld [vmem:[%s2655_s5] sm:$0xff] }
  0x1a   : > { %s1615_s12 = sshll.u32 %s482_s26, 3 }
  0x1b   : > { %s2323_s23 = scalar_lea.vmem %s2668_s1, %s1615_s12  ;;  %s2334_s26 = scalar_lea.vmem %s2671_s0, %s1615_s12  ;;  %937 = vperm.xlu0 %2045, %v911_v27   ;;  %942 = vperm.xlu1 %2046, %v912_v28  }
  0x1c   : > { %v536_v8 = vld [vmem:[%s2323_s23] sm:$0xff]  ;;  %v537_v9 = vld [vmem:[%s2323_s23 + $0x8] sm:$0xff]  ;;  %v538_v13 = vld [vmem:[%s2323_s23 + $0x10] sm:$0xff]  ;;  %s2104_s12 = scalar_lea.vmem %s2610_s16, 16  ;;  %s2108_s0 = sshll.u32 %s2184_s24, 4  ;;  %s2109_s0 = int_to_ptr.vmem [resolvable:$false] %s2108_s0 }
  0x1d   : > { %v512_v10 = vld [vmem:[%s2334_s26] sm:$0xff]  ;;  %v1862_v11 = vpack.c.bf16 %v537_v9, %v536_v8  ;;  %v513_v12 = vld [vmem:[%s2334_s26 + $0x8] sm:$0xff]  ;;  %v539_v14 = vld [vmem:[%s2323_s23 + $0x18] sm:$0xff]  ;;  %p2105_p11 = scmp.ne.s32.totalorder %s2610_s16, %s2104_s12  ;;  %s2110_s1 = scalar_lea.vmem %s2109_s0, 32 }
  0x1e   : > { %v1910_v15 = vpack.c.bf16 %v513_v12, %v512_v10  ;;  %v1868_v16 = vpack.c.bf16 %v539_v14, %v538_v13  ;;  %v514_v17 = vld [vmem:[%s2334_s26 + $0x10] sm:$0xff]  ;;  %v515_v18 = vld [vmem:[%s2334_s26 + $0x18] sm:$0xff]  ;;  %v540_v21 = vld [vmem:[%s2323_s23 + $0x20] sm:$0xff]  ;;  %p2111_p0 = scmp.lt.s32.totalorder %s2610_s16, %s2109_s0  ;;  %p2112_p1 = scmp.lt.s32.totalorder %s2110_s1, %s2104_s12 }
  0x1f   : > { %1864 = vmatprep.subr.msk.bf16.mxu1 %vm2327_vm1, %v1862_v11  ;;  %v1916_v19 = vpack.c.bf16 %v515_v18, %v514_v17  ;;  %v541_v22 = vld [vmem:[%s2323_s23 + $0x28] sm:$0xff]  ;;  %v516_v23 = vld [vmem:[%s2334_s26 + $0x20] sm:$0xff]  ;;  %v542_v31 = vld [vmem:[%s2323_s23 + $0x30] sm:$0xff]  ;;  %947 = vperm.xlu0 %2045, %v913_v29   ;;  %p2106_p12 = pnand %p2105_p11, %p2293_p5 }
  0x20   : > { %1912 = vmatprep.subr.msk.bf16.mxu0 %vm2327_vm1, %v1910_v15  ;;  %1867 = vmatpush3.bf16.xpose.msk.msra.mxu1 %vm2327_vm1, %v1862_v11  ;;  %v517_v24 = vld [vmem:[%s2334_s26 + $0x28] sm:$0xff]  ;;  %v1874_v25 = vpack.c.bf16 %v541_v22, %v540_v21  ;;  %v543_v32 = vld [vmem:[%s2323_s23 + $0x38] sm:$0xff]  ;;  %v518_v33 = vld [vmem:[%s2334_s26 + $0x30] sm:$0xff]  ;;  %p2113_p2 = por %p2112_p1, %p2111_p0 }
  0x21   : > { %1915 = vmatpush3.bf16.xpose.msk.msra.mxu0 %vm2327_vm1, %v1910_v15  ;;  %1870 = vmatprep.subr.msk.bf16.mxu1 %vm2327_vm1, %v1868_v16  ;;  %v1922_v26 = vpack.c.bf16 %v517_v24, %v516_v23  ;;  %v519_v34 = vld [vmem:[%s2334_s26 + $0x38] sm:$0xff]  ;;  %v1880_v36 = vpack.c.bf16 %v543_v32, %v542_v31  ;;  %v544_v41 = vld [vmem:[%s2323_s23 + $0x40] sm:$0xff]  ;;  %v545_v42 = vld [vmem:[%s2323_s23 + $0x48] sm:$0xff]  ;;  %p2107_p13 = pneg %p2106_p12 }
  0x22   : > { %1918 = vmatprep.subr.msk.bf16.mxu0 %vm2327_vm1, %v1916_v19  ;;  %952 = vperm.xlu1 %2046, %v914_v30   ;;  %v1928_v38 = vpack.c.bf16 %v519_v34, %v518_v33  ;;  %v520_v43 = vld [vmem:[%s2334_s26 + $0x40] sm:$0xff]  ;;  %v521_v44 = vld [vmem:[%s2334_s26 + $0x48] sm:$0xff]  ;;  %v1886_v46 = vpack.c.bf16 %v545_v42, %v544_v41  ;;  %v546_v51 = vld [vmem:[%s2323_s23 + $0x50] sm:$0xff] }
  0x23   : > { %1005 = vperm.xlu0 %2045, %v999_v35   ;;  %v1934_v48 = vpack.c.bf16 %v521_v44, %v520_v43  ;;  %v547_v52 = vld [vmem:[%s2323_s23 + $0x58] sm:$0xff]  ;;  %v522_v53 = vld [vmem:[%s2334_s26 + $0x50] sm:$0xff]  ;;  %v548_v57 = vld [vmem:[%s2323_s23 + $0x60] sm:$0xff]  ;;  %p2114_p3 = pnand %p2113_p2, %p2107_p13 }
  0x24   : > { %v523_v54 = vld [vmem:[%s2334_s26 + $0x58] sm:$0xff]  ;;  %v1892_v55 = vpack.c.bf16 %v547_v52, %v546_v51  ;;  %v549_v58 = vld [vmem:[%s2323_s23 + $0x68] sm:$0xff]  ;;  %v524_v59 = vld [vmem:[%s2334_s26 + $0x60] sm:$0xff] }
  0x25   : > { %v1940_v56 = vpack.c.bf16 %v523_v54, %v522_v53  ;;  %v525_v60 = vld [vmem:[%s2334_s26 + $0x68] sm:$0xff]  ;;  %v1898_v61 = vpack.c.bf16 %v549_v58, %v548_v57  ;;  %v550_v63 = vld [vmem:[%s2323_s23 + $0x70] sm:$0xff]  ;;  %v551_v0 = vld [vmem:[%s2323_s23 + $0x78] sm:$0xff] }
  0x26   : > { %1010 = vperm.xlu1 %2046, %v1000_v37   ;;  %v1946_v62 = vpack.c.bf16 %v525_v60, %v524_v59  ;;  %v526_v1 = vld [vmem:[%s2334_s26 + $0x70] sm:$0xff]  ;;  %v527_v2 = vld [vmem:[%s2334_s26 + $0x78] sm:$0xff]  ;;  %v1904_v4 = vpack.c.bf16 %v551_v0, %v550_v63  ;;  %v505_v8 = vld [vmem:[%s2652_s2 + $0x8] sm:$0xff] }
  0x27   : > { %1015 = vperm.xlu0 %2045, %v1001_v39   ;;  %v1952_v6 = vpack.c.bf16 %v527_v2, %v526_v1  ;;  %v530_v9 = vld [vmem:[%s2653_s3 + $0x10] sm:$0xff]  ;;  %v507_v11 = vld [vmem:[%s2652_s2 + $0x18] sm:$0xff]  ;;  %v532_v12 = vld [vmem:[%s2653_s3 + $0x20] sm:$0xff] }
  0x28   : > { %1873 = vmatpush3.bf16.xpose.msk.msra.mxu1 %vm2327_vm1, %v1868_v16  ;;  %v506_v10 = vld [vmem:[%s2652_s2 + $0x10] sm:$0xff]  ;;  %v508_v13 = vld [vmem:[%s2652_s2 + $0x20] sm:$0xff]  ;;  %v533_v14 = vld [vmem:[%s2653_s3 + $0x28] sm:$0xff] }
  0x29   : > { %1921 = vmatpush3.bf16.xpose.msk.msra.mxu0 %vm2327_vm1, %v1916_v19  ;;  %1876 = vmatprep.subr.msk.bf16.mxu1 %vm2327_vm1, %v1874_v25  ;;  %v509_v15 = vld [vmem:[%s2652_s2 + $0x28] sm:$0xff]  ;;  %v534_v16 = vld [vmem:[%s2653_s3 + $0x30] sm:$0xff]  ;;  %v535_v18 = vld [vmem:[%s2653_s3 + $0x38] sm:$0xff] }
  0x2a   : > { %1924 = vmatprep.subr.msk.bf16.mxu0 %vm2327_vm1, %v1922_v26  ;;  %1020 = vperm.xlu1 %2046, %v1002_v40   ;;  %v510_v17 = vld [vmem:[%s2652_s2 + $0x30] sm:$0xff]  ;;  %v511_v19 = vld [vmem:[%s2652_s2 + $0x38] sm:$0xff] }
  0x2b   : > { %1142 = vperm.xlu0 %2045, %v1138_v45  }
  0x2e   : > { %1147 = vperm.xlu1 %2046, %v1139_v47  }
  0x2f   : > { %1249 = vperm.xlu0 %2045, %v2428_v49  }
  0x30   : > { %1879 = vmatpush3.bf16.xpose.msk.msra.mxu1 %vm2327_vm1, %v1874_v25 }
  0x31   : > { %1927 = vmatpush3.bf16.xpose.msk.msra.mxu0 %vm2327_vm1, %v1922_v26  ;;  %1882 = vmatprep.subr.msk.bf16.mxu1 %vm2327_vm1, %v1880_v36 }
  0x32   : > { %1930 = vmatprep.subr.msk.bf16.mxu0 %vm2327_vm1, %v1928_v38  ;;  %1244 = vperm.xlu1 %2046, %v1241_v50  }
  0x38   : > { %1885 = vmatpush3.bf16.xpose.msk.msra.mxu1 %vm2327_vm1, %v1880_v36 }
  0x39   : > { %1933 = vmatpush3.bf16.xpose.msk.msra.mxu0 %vm2327_vm1, %v1928_v38  ;;  %1888 = vmatprep.subr.msk.bf16.mxu1 %vm2327_vm1, %v1886_v46 }
  0x3a   : > { %1936 = vmatprep.subr.msk.bf16.mxu0 %vm2327_vm1, %v1934_v48 }
  0x40   : > { %1891 = vmatpush3.bf16.xpose.msk.msra.mxu1 %vm2327_vm1, %v1886_v46 }
  0x41   : > { %1939 = vmatpush3.bf16.xpose.msk.msra.mxu0 %vm2327_vm1, %v1934_v48  ;;  %1894 = vmatprep.subr.msk.bf16.mxu1 %vm2327_vm1, %v1892_v55 }
  0x42   : > { %1942 = vmatprep.subr.msk.bf16.mxu0 %vm2327_vm1, %v1940_v56 }
  0x48   : > { %1897 = vmatpush3.bf16.xpose.msk.msra.mxu1 %vm2327_vm1, %v1892_v55 }
  0x49   : > { %1945 = vmatpush3.bf16.xpose.msk.msra.mxu0 %vm2327_vm1, %v1940_v56  ;;  %1900 = vmatprep.subr.msk.bf16.mxu1 %vm2327_vm1, %v1898_v61 }
  0x4a   : > { %1948 = vmatprep.subr.msk.bf16.mxu0 %vm2327_vm1, %v1946_v62 }
  0x50   : > { %1903 = vmatpush3.bf16.xpose.msk.msra.mxu1 %vm2327_vm1, %v1898_v61 }
  0x51   : > { %1951 = vmatpush3.bf16.xpose.msk.msra.mxu0 %vm2327_vm1, %v1946_v62  ;;  %1906 = vmatprep.subr.msk.bf16.mxu1 %vm2327_vm1, %v1904_v4 }
  0x52   : > { %1954 = vmatprep.subr.msk.bf16.mxu0 %vm2327_vm1, %v1952_v6 }
  0x58   : > { %1909 = vmatpush3.bf16.xpose.msk.msra.mxu1 %vm2327_vm1, %v1904_v4 }
  0x59   : > { %1957 = vmatpush3.bf16.xpose.msk.msra.mxu0 %vm2327_vm1, %v1952_v6 }
  0x5f   : > { %1774 = vmatmul.mubr.msk.f32.vlgmr.msra.gmra.mrb[0].mxu1 %vm552_vm0, %v529_v7 }
  0x60   : > { %1818 = vmatmul.mubr.msk.f32.vlgmr.msra.gmra.mrb[0].mxu0 %vm552_vm0, %v505_v8  ;;  %1776 = vmatprep.mubr.msk.f32.mxu1 %vm552_vm0, %v530_v9 }
  0x61   : > { %1820 = vmatprep.mubr.msk.f32.mxu0 %vm552_vm0, %v506_v10 }
  0x63   : > { %1777 = vmatmul.mubr.msk.f32.gmra.mrb[2].mxu1 %vm552_vm0, %v531_v5 }
  0x64   : > { %1821 = vmatmul.mubr.msk.f32.gmra.mrb[2].mxu0 %vm552_vm0, %v507_v11  ;;  %1779 = vmatprep.mubr.msk.f32.mxu1 %vm552_vm0, %v532_v12 }
  0x65   : > { %1823 = vmatprep.mubr.msk.f32.mxu0 %vm552_vm0, %v508_v13 }
  0x67   : > { %1780 = vmatmul.mubr.msk.f32.gmra.mrb[4].mxu1 %vm552_vm0, %v533_v14 }
  0x68   : > { %1824 = vmatmul.mubr.msk.f32.gmra.mrb[4].mxu0 %vm552_vm0, %v509_v15  ;;  %1782 = vmatprep.mubr.msk.f32.mxu1 %vm552_vm0, %v534_v16 }
  0x69   : > { %1826 = vmatprep.mubr.msk.f32.mxu0 %vm552_vm0, %v510_v17 }
  0x6b   : > { %1783 = vmatmul.mubr.msk.f32.gmra.mrb[6].mxu1 %vm552_vm0, %v535_v18 }
  0x6c   : > { %1827 = vmatmul.mubr.msk.f32.gmra.mrb[6].mxu0 %vm552_vm0, %v511_v19 }
  0x6d   : > { %1845 = vmatprep.mubr.msk.f32.mxu0 %vm552_vm0, %v995_v20 }
  0x92   : > { %v928_v21 = vpop.permute.xlu1 %927  ;;  %v918_v22 = vpop.permute.xlu0 %917 }
  0x96   : > { %v933_v26 = vpop.permute.xlu1 %932  ;;  %v923_v29 = vpop.permute.xlu0 %922 }
  0x9a   : > { %v943_v41 = vpop.permute.xlu1 %942  ;;  %v938_v47 = vpop.permute.xlu0 %937 }
  0x9e   : > { %v948_v1 = vpop.permute.xlu0 %947 }
  0xa1   : > { %v953_v62 = vpop.permute.xlu1 %952 }
 0x132   : > { %v1775_v23 = vpop.f32.mrb[0].mxu1 }
 0x133   : > { %v1819_v24 = vpop.f32.mrb[0].mxu0  ;;  %v691_v25 = vpop.f32.mrb[1].mxu1 }
 0x134   : > { %v874_v27 = vadd.f32 %v1819_v24, %v1775_v23  ;;  %v868_v28 = vpop.f32.mrb[1].mxu0 }
 0x135   : > { %v869_v30 = vadd.f32 %v868_v28, %v691_v25 }
 0x136   : > { %v956_v31 = vadd.f32 %v923_v29, %v874_v27  ;;  %v1778_v32 = vpop.f32.mrb[2].mxu1 }
 0x137   : > { %v955_v33 = vadd.f32 %v918_v22, %v869_v30  ;;  %v1822_v34 = vpop.f32.mrb[2].mxu0  ;;  %v701_v35 = vpop.f32.mrb[3].mxu1 }
 0x138   : > { %v964_v36 = vmul.f32 0.5, %v956_v31  ;;  %v884_v37 = vadd.f32 %v1822_v34, %v1778_v32  ;;  %v878_v38 = vpop.f32.mrb[3].mxu0 }
 0x139   : > { %v963_v39 = vmul.f32 0.5, %v955_v33  ;;  %v879_v40 = vadd.f32 %v878_v38, %v701_v35  ;;  %v996_v35 = vld [vmem:[%s2655_s5 + $0x8] sm:$0xff]  ;;  %v1136_v38 = vld [vmem:[%s2657_s7] sm:$0xff] }
 0x13a   : > { %2072 = vtanh.f32 %v964_v36  ;;  %v958_v42 = vadd.f32 %v933_v26, %v884_v37  ;;  %v1781_v43 = vpop.f32.mrb[4].mxu1  ;;  %v997_v36 = vld [vmem:[%s2655_s5 + $0x10] sm:$0xff]  ;;  %v998_v37 = vld [vmem:[%s2655_s5 + $0x18] sm:$0xff]  ;;  %1859 = vmatprep.mubr.msk.f32.mxu1 %vm1150_vm2, %v1136_v38 }
 0x13b   : > { %2074 = vtanh.f32 %v963_v39  ;;  %v957_v44 = vadd.f32 %v928_v21, %v879_v40  ;;  %v1825_v45 = vpop.f32.mrb[4].mxu0  ;;  %v711_v46 = vpop.f32.mrb[5].mxu1  ;;  %v2169_v39 = vmov 2   ;;  %v2170_v40 = vmov 1  }
 0x13c   : > { %v966_v48 = vmul.f32 0.5, %v958_v42  ;;  %v894_v50 = vadd.f32 %v1825_v45, %v1781_v43  ;;  %v888_v51 = vpop.f32.mrb[5].mxu0  ;;  %2048 = vset.pattern.permute.xlu1 %v2169_v39  ;;  %2047 = vset.pattern.permute.xlu0 %v2170_v40  ;;  %v2172_v42 = vmov 4   ;;  %v2173_v43 = vmov 5  }
 0x13d   : > { %v965_v52 = vmul.f32 0.5, %v957_v44  ;;  %v889_v53 = vadd.f32 %v888_v51, %v711_v46  ;;  %1269 = vperm.xlu1 %2048, %v2428_v49   ;;  %1259 = vperm.xlu0 %2047, %v2428_v49   ;;  %v2174_v44 = vmov 7   ;;  %v2175_v45 = vmov 6   ;;  %v1412_v51 = vld [vmem:[%s2661_s11] sm:$0x1] }
 0x13e   : > { %2076 = vtanh.f32 %v966_v48  ;;  %v960_v54 = vadd.f32 %v943_v41, %v894_v50  ;;  %v1784_v55 = vpop.f32.mrb[6].mxu1  ;;  %v2171_v41 = vmov 3   ;;  %v2176_v46 = vmov 10  }
 0x13f   : > { %2078 = vtanh.f32 %v965_v52  ;;  %v959_v56 = vadd.f32 %v938_v47, %v889_v53  ;;  %v1828_v57 = vpop.f32.mrb[6].mxu0  ;;  %v721_v58 = vpop.f32.mrb[7].mxu1  ;;  %v2177_v47 = vmov 8   ;;  %v2178_v48 = vmov 13  }
 0x140   : > { %v968_v59 = vmul.f32 0.5, %v960_v54  ;;  %v904_v60 = vadd.f32 %v1828_v57, %v1784_v55  ;;  %v898_v61 = vpop.f32.mrb[7].mxu0  ;;  %v2179_v50 = vmov 9   ;;  %v2180_v52 = vmov 11   ;;  %v1011_v57 = vpop.permute.xlu1 %1010 }
 0x141   : > { %v967_v63 = vmul.f32 0.5, %v959_v56  ;;  %v899_v0 = vadd.f32 %v898_v61, %v721_v58  ;;  %2049 = vset.pattern.permute.xlu1 %v2171_v41  ;;  %2050 = vset.pattern.permute.xlu0 %v2172_v42  ;;  %v2181_v53 = vmov 12   ;;  %v2182_v54 = vmov 14   ;;  %v1413_v56 = vld [vmem:[#allocation2] sm:$0x1]  ;;  %v1006_v58 = vpop.permute.xlu0 %1005 }
 0x142   : > { %2080 = vtanh.f32 %v968_v59  ;;  %v962_v2 = vadd.f32 %v953_v62, %v904_v60  ;;  %1279 = vperm.xlu1 %2049, %v2428_v49   ;;  %1289 = vperm.xlu0 %2050, %v2428_v49   ;;  %v2183_v55 = vmov 15  }
 0x143   : > { %2082 = vtanh.f32 %v967_v63  ;;  %v961_v4 = vadd.f32 %v948_v1, %v899_v0 }
 0x144   : > { %v2073_v6 = vpop.eup %2072  ;;  %v970_v7 = vmul.f32 0.5, %v962_v2  ;;  %v1021_v63 = vpop.permute.xlu1 %1020 }
 0x145   : > { %v2075_v8 = vpop.eup %2074  ;;  %v980_v9 = vadd.f32 1.0, %v2073_v6  ;;  %v969_v10 = vmul.f32 0.5, %v961_v4 }
 0x146   : > { %v979_v5 = vadd.f32 1.0, %v2075_v8  ;;  %2084 = vtanh.f32 %v970_v7  ;;  %2051 = vset.pattern.permute.xlu1 %v2173_v43  ;;  %2053 = vset.pattern.permute.xlu0 %v2174_v44 }
 0x147   : > { %2086 = vtanh.f32 %v969_v10  ;;  %v988_v11 = vmul.f32 0.5, %v980_v9  ;;  %1299 = vperm.xlu1 %2051, %v2428_v49   ;;  %1319 = vperm.xlu0 %2053, %v2428_v49  }
 0x148   : > { %v2077_v12 = vpop.eup %2076  ;;  %v987_v13 = vmul.f32 0.5, %v979_v5 }
 0x149   : > { %v2079_v14 = vpop.eup %2078  ;;  %v982_v15 = vadd.f32 1.0, %v2077_v12 }
 0x14a   : > { %v981_v16 = vadd.f32 1.0, %v2079_v14  ;;  %v1958_v17 = vpack.c.bf16 %v988_v11, %v987_v13 }
 0x14b   : > { %v990_v18 = vmul.f32 0.5, %v982_v15  ;;  %2052 = vset.pattern.permute.xlu1 %v2175_v45  ;;  %2056 = vset.pattern.permute.xlu0 %v2176_v46 }
 0x14c   : > { %v2081_v19 = vpop.eup %2080  ;;  %1959 = vmatprep.subr.bf16.mxu0 %v1958_v17  ;;  %v989_v20 = vmul.f32 0.5, %v981_v16  ;;  %1309 = vperm.xlu1 %2052, %v2428_v49  }
 0x14d   : > { %v2083_v21 = vpop.eup %2082  ;;  %v984_v22 = vadd.f32 1.0, %v2081_v19  ;;  %1961 = vmatpush3.bf16.msra.mxu0 %v1958_v17  ;;  %1349 = vperm.xlu0 %2056, %v2428_v49  }
 0x14e   : > { %v983_v23 = vadd.f32 1.0, %v2083_v21  ;;  %v1962_v24 = vpack.c.bf16 %v990_v18, %v989_v20 }
 0x14f   : > { %v992_v25 = vmul.f32 0.5, %v984_v22  ;;  %v1137_v22 = vld [vmem:[%s2657_s7 + $0x8] sm:$0xff] }
 0x150   : > { %v2085_v26 = vpop.eup %2084  ;;  %1963 = vmatprep.subr.bf16.mxu0 %v1962_v24  ;;  %v991_v27 = vmul.f32 0.5, %v983_v23  ;;  %2054 = vset.pattern.permute.xlu1 %v2177_v47  ;;  %v1148_v23 = vpop.permute.xlu1 %1147 }
 0x151   : > { %v2087_v28 = vpop.eup %2086  ;;  %v986_v29 = vadd.f32 1.0, %v2085_v26  ;;  %1965 = vmatpush3.bf16.msra.mxu0 %v1962_v24  ;;  %1329 = vperm.xlu1 %2054, %v2428_v49  }
 0x152   : > { %v985_v30 = vadd.f32 1.0, %v2087_v28  ;;  %v1966_v31 = vpack.c.bf16 %v992_v25, %v991_v27  ;;  %2059 = vset.pattern.permute.xlu0 %v2178_v48 }
 0x153   : > { %v994_v32 = vmul.f32 0.5, %v986_v29  ;;  %1379 = vperm.xlu0 %2059, %v2428_v49  }
 0x154   : > { %1967 = vmatprep.subr.bf16.mxu0 %v1966_v31  ;;  %v993_v33 = vmul.f32 0.5, %v985_v30  ;;  %v1245_v24 = vpop.permute.xlu1 %1244 }
 0x155   : > { %1969 = vmatpush3.bf16.msra.mxu0 %v1966_v31  ;;  %2055 = vset.pattern.permute.xlu1 %v2179_v50 }
 0x156   : > { %v1970_v34 = vpack.c.bf16 %v994_v32, %v993_v33  ;;  %1339 = vperm.xlu1 %2055, %v2428_v49  }
 0x157   : > { %2062 = vset.pattern.permute.xlu0 %v2168_v3 }
 0x158   : > { %1971 = vmatprep.subr.bf16.mxu0 %v1970_v34  ;;  %1425 = vperm.xlu0 %2062, %v1412_v51  }
 0x159   : > { %1973 = vmatpush3.bf16.msra.mxu0 %v1970_v34 }
 0x15a   : > { %2057 = vset.pattern.permute.xlu1 %v2180_v52 }
 0x15b   : > { %1359 = vperm.xlu1 %2057, %v2428_v49  }
 0x15c   : > { %1846 = vmatmul.mubr.msk.f32.vlgmr.msra.gmra.mrb[8].mxu0 %vm552_vm0, %v996_v35  ;;  %2065 = vset.pattern.permute.xlu0 %v2169_v39 }
 0x15d   : > { %1848 = vmatprep.mubr.msk.f32.mxu0 %vm552_vm0, %v997_v36  ;;  %1448 = vperm.xlu0 %2065, %v1412_v51   ;;  %v1252_v36 = vlaneseq }
 0x15f   : > { %2058 = vset.pattern.permute.xlu1 %v2181_v53  ;;  %v2580_v39 = vshrl.u32 %v1252_v36, 7 }
 0x160   : > { %1849 = vmatmul.mubr.msk.f32.gmra.mrb[10].mxu0 %vm552_vm0, %v998_v37  ;;  %1369 = vperm.xlu1 %2058, %v2428_v49  }
 0x161   : > { %2068 = vset.pattern.permute.xlu0 %v2173_v43  ;;  %v1274_v47 = vsub.s32 2, %v2580_v39 }
 0x162   : > { %1487 = vperm.xlu0 %2068, %v1412_v51  }
 0x164   : > { %2060 = vset.pattern.permute.xlu1 %v2182_v54 }
 0x165   : > { %1389 = vperm.xlu1 %2060, %v2428_v49  }
 0x166   : > { %2071 = vset.pattern.permute.xlu0 %v2174_v44 }
 0x169   : > { %2061 = vset.pattern.permute.xlu1 %v2183_v55 }
 0x16a   : > { %1399 = vperm.xlu1 %2061, %v2428_v49  }
 0x16e   : > { %2063 = vset.pattern.permute.xlu1 %v2170_v40 }
 0x16f   : > { %1435 = vperm.xlu1 %2063, %v1412_v51  }
 0x173   : > { %2064 = vset.pattern.permute.xlu1 %v2168_v3  ;;  %v1016_v3 = vpop.permute.xlu0 %1015 }
 0x174   : > { %1416 = vperm.xlu1 %2064, %v1413_v56   ;;  %v1294_v56 = vsub.s32 4, %v2580_v39 }
 0x177   : > { %v1143_v30 = vpop.permute.xlu0 %1142 }
 0x178   : > { %2066 = vset.pattern.permute.xlu1 %v2171_v41 }
 0x179   : > { %1461 = vperm.xlu1 %2066, %v1412_v51  }
 0x17d   : > { %2067 = vset.pattern.permute.xlu1 %v2172_v42  ;;  %v2583_v42 = vsub.s32 0, %v2580_v39 }
 0x17e   : > { %1474 = vperm.xlu1 %2067, %v1412_v51  }
 0x182   : > { %2069 = vset.pattern.permute.xlu1 %v2175_v45  ;;  %v1250_v45 = vpop.permute.xlu0 %1249 }
 0x183   : > { %1500 = vperm.xlu1 %2069, %v1412_v51  }
 0x187   : > { %2070 = vset.pattern.permute.xlu1 %v2174_v44  ;;  %v1264_v44 = vsub.s32 1, %v2580_v39 }
 0x188   : > { %1513 = vperm.xlu1 %2070, %v1412_v51   ;;  %v1284_v51 = vsub.s32 3, %v2580_v39 }
 0x1bc   : > { %v1270_v25 = vpop.permute.xlu1 %1269  ;;  %v1260_v52 = vpop.permute.xlu0 %1259 }
 0x1c1   : > { %v1280_v26 = vpop.permute.xlu1 %1279 }
 0x1c6   : > { %v1300_v27 = vpop.permute.xlu1 %1299 }
 0x1cb   : > { %v1310_v28 = vpop.permute.xlu1 %1309 }
 0x1d0   : > { %v1330_v33 = vpop.permute.xlu1 %1329 }
 0x1d5   : > { %v1340_v38 = vpop.permute.xlu1 %1339 }
 0x1da   : > { %v1360_v41 = vpop.permute.xlu1 %1359 }
 0x1df   : > { %v1370_v53 = vpop.permute.xlu1 %1369 }
 0x22f   : > { %v1847_v59 = vpop.f32.mrb[8].mxu0 }
 0x230   : > { %v1107_v60 = vadd.f32 %v1847_v59, %v1011_v57  ;;  %v1101_v61 = vpop.f32.mrb[9].mxu0 }
 0x231   : > { %v1102_v49 = vadd.f32 %v1101_v61, %v1006_v58  ;;  %v1304_v61 = vsub.s32 5, %v2580_v39 }
 0x232   : > { %v1121_v62 = vmul.f32 0.5, %v1107_v60 }
 0x233   : > { %v1120_v0 = vmul.f32 0.5, %v1102_v49  ;;  %v1850_v1 = vpop.f32.mrb[10].mxu0  ;;  %v1314_v49 = vsub.s32 6, %v2580_v39 }
 0x234   : > { %2088 = vtanh.f32 %v1121_v62  ;;  %v1117_v2 = vadd.f32 %v1850_v1, %v1021_v63  ;;  %v1111_v4 = vpop.f32.mrb[11].mxu0 }
 0x235   : > { %2090 = vtanh.f32 %v1120_v0  ;;  %v1112_v6 = vadd.f32 %v1111_v4, %v1016_v3  ;;  %v1290_v3 = vpop.permute.xlu0 %1289 }
 0x236   : > { %v1123_v7 = vmul.f32 0.5, %v1117_v2  ;;  %v1390_v2 = vpop.permute.xlu1 %1389 }
 0x237   : > { %v1122_v8 = vmul.f32 0.5, %v1112_v6 }
 0x238   : > { %2092 = vtanh.f32 %v1123_v7 }
 0x239   : > { %2094 = vtanh.f32 %v1122_v8  ;;  %v1324_v8 = vsub.s32 7, %v2580_v39 }
 0x23e   : > { %v2089_v9 = vpop.eup %2088 }
 0x23f   : > { %v2091_v10 = vpop.eup %2090  ;;  %v1129_v5 = vadd.f32 1.0, %v2089_v9 }
 0x240   : > { %v1128_v11 = vadd.f32 1.0, %v2091_v10 }
 0x241   : > { %v1133_v12 = vmul.f32 0.5, %v1129_v5 }
 0x242   : > { %v2093_v13 = vpop.eup %2092  ;;  %v1132_v14 = vmul.f32 0.5, %v1128_v11 }
 0x243   : > { %v2095_v15 = vpop.eup %2094  ;;  %v1131_v16 = vadd.f32 1.0, %v2093_v13 }
 0x244   : > { %v1130_v17 = vadd.f32 1.0, %v2095_v15  ;;  %v1974_v18 = vpack.c.bf16 %v1133_v12, %v1132_v14  ;;  %v1320_v15 = vpop.permute.xlu0 %1319 }
 0x245   : > { %v1135_v19 = vmul.f32 0.5, %v1131_v16  ;;  %v1400_v16 = vpop.permute.xlu1 %1399 }
 0x246   : > { %v1134_v20 = vmul.f32 0.5, %v1130_v17  ;;  %1975 = vmatprep.subr.bf16.mxu1 %v1974_v18 }
 0x247   : > { %1977 = vmatpush3.bf16.msra.mxu1 %v1974_v18 }
 0x248   : > { %v1978_v21 = vpack.c.bf16 %v1135_v19, %v1134_v20 }
 0x24a   : > { %1979 = vmatprep.subr.bf16.mxu1 %v1978_v21 }
 0x24b   : > { %1981 = vmatpush3.bf16.msra.mxu1 %v1978_v21 }
 0x24e   : > { %1860 = vmatmul.mubr.msk.f32.vlgmr.msra.gmra.mrb[8].mxu1 %vm1150_vm2, %v1137_v22 }
 0x321   : > { %v1861_v29 = vpop.f32.mrb[8].mxu1 }
 0x322   : > { %v1223_v31 = vpop.f32.mrb[9].mxu1  ;;  %v1229_v35 = vadd.f32 %v1861_v29, %v1148_v23  ;;  %v1436_v23 = vpop.permute.xlu1 %1435 }
 0x323   : > { %v1224_v32 = vadd.f32 %v1223_v31, %v1143_v30  ;;  %v1350_v29 = vpop.permute.xlu0 %1349 }
 0x324   : > { %v1233_v37 = vmul.f32 0.5, %v1229_v35 }
 0x325   : > { %v1232_v34 = vmul.f32 0.5, %v1224_v32 }
 0x326   : > { %v1417_v36 = vpop.permute.xlu1 %1416 }
 0x327   : > { %2096 = vtanh.f32 %v1232_v34 }
 0x328   : > { %2098 = vtanh.f32 %v1233_v37 }
 0x331   : > { %v2097_v40 = vpop.eup %2096 }
 0x332   : > { %v1236_v43 = vadd.f32 1.0, %v2097_v40  ;;  %v2099_v57 = vpop.eup %2098 }
 0x333   : > { %v1237_v62 = vadd.f32 1.0, %v2099_v57 }
 0x334   : > { %v1238_v46 = vmul.f32 0.5, %v1236_v43  ;;  %v1380_v43 = vpop.permute.xlu0 %1379 }
 0x335   : > { %v1239_v9 = vmul.f32 0.5, %v1237_v62 }
 0x336   : > { %v1255_v48 = vrot.slane %v1238_v46, %v2583_v42  ;;  %v1265_v50 = vrot.slane %v1238_v46, %v1264_v44  ;;  %v1275_v55 = vrot.slane %v1238_v46, %v1274_v47  ;;  %v1285_v60 = vrot.slane %v1238_v46, %v1284_v51 }
 0x337   : > { %v1295_v1 = vrot.slane %v1238_v46, %v1294_v56  ;;  %v1305_v7 = vrot.slane %v1238_v46, %v1304_v61  ;;  %v1315_v11 = vrot.slane %v1238_v46, %v1314_v49  ;;  %v1325_v14 = vrot.slane %v1238_v46, %v1324_v8 }
 0x338   : > { %v1256_v54 = vmul.f32 %v1255_v48, %v1250_v45  ;;  %v1266_v59 = vmul.f32 %v1265_v50, %v1260_v52  ;;  %v1276_v0 = vmul.f32 %v1275_v55, %v1270_v25  ;;  %v1286_v6 = vmul.f32 %v1285_v60, %v1280_v26  ;;  %v1462_v50 = vpop.permute.xlu1 %1461  ;;  %v1426_v57 = vpop.permute.xlu0 %1425 }
 0x339   : > { %v1296_v5 = vmul.f32 %v1295_v1, %v1290_v3  ;;  %v1306_v13 = vmul.f32 %v1305_v7, %v1300_v27  ;;  %v1335_v17 = vrot.slane %v1239_v9, %v2583_v42  ;;  %v1316_v19 = vmul.f32 %v1315_v11, %v1310_v28 }
 0x33a   : > { %v1257_v58 = vadd.f32 %v1256_v54, %v1245_v24  ;;  %v1345_v20 = vrot.slane %v1239_v9, %v1264_v44  ;;  %v1326_v22 = vmul.f32 %v1325_v14, %v1320_v15  ;;  %v1355_v26 = vrot.slane %v1239_v9, %v1274_v47 }
 0x33b   : > { %v1336_v24 = vmul.f32 %v1335_v17, %v1330_v33  ;;  %v1365_v31 = vrot.slane %v1239_v9, %v1284_v51  ;;  %v1375_v34 = vrot.slane %v1239_v9, %v1294_v56  ;;  %v1385_v40 = vrot.slane %v1239_v9, %v1304_v61 }
 0x33c   : > { %v1267_v63 = vadd.f32 %v1266_v59, %v1257_v58  ;;  %v1346_v30 = vmul.f32 %v1345_v20, %v1340_v38  ;;  %v1356_v35 = vmul.f32 %v1355_v26, %v1350_v29  ;;  %v1395_v44 = vrot.slane %v1239_v9, %v1314_v49  ;;  %v1475_v55 = vpop.permute.xlu1 %1474  ;;  %v1449_v58 = vpop.permute.xlu0 %1448 }
 0x33d   : > { %v1366_v37 = vmul.f32 %v1365_v31, %v1360_v41  ;;  %v1376_v28 = vmul.f32 %v1375_v34, %v1370_v53  ;;  %v1405_v46 = vrot.slane %v1239_v9, %v1324_v8  ;;  %v1386_v33 = vmul.f32 %v1385_v40, %v1380_v43 }
 0x33e   : > { %v1277_v4 = vadd.f32 %v1276_v0, %v1267_v63  ;;  %v1396_v47 = vmul.f32 %v1395_v44, %v1390_v2  ;;  %v1454_v61 = vrot.slane %v1449_v58, %v2583_v42  ;;  %v1441_v63 = vrot.slane %v1436_v23, %v2583_v42 }
 0x33f   : > { %v1406_v38 = vmul.f32 %v1405_v46, %v1400_v16  ;;  %v1431_v0 = vrot.slane %v1426_v57, %v2583_v42  ;;  %v1422_v1 = vrot.slane %v1417_v36, %v2583_v42 }
 0x340   : > { %v1287_v10 = vadd.f32 %v1286_v6, %v1277_v4  ;;  %v1501_v41 = vpop.permute.xlu1 %1500  ;;  %v1488_v3 = vpop.permute.xlu0 %1487  ;;  %v1467_v4 = vrot.slane %v1462_v50, %v2583_v42  ;;  %v1480_v6 = vrot.slane %v1475_v55, %v2583_v42 }
 0x341   : > { %v1506_v15 = vrot.slane %v1501_v41, %v2583_v42 }
 0x342   : > { %v1297_v12 = vadd.f32 %v1296_v5, %v1287_v10 }
 0x344   : > { %v1307_v18 = vadd.f32 %v1306_v13, %v1297_v12  ;;  %v1514_v59 = vpop.permute.xlu1 %1513  ;;  %v1493_v12 = vrot.slane %v1488_v3, %v2583_v42 }
 0x345   : > { %v1519_v49 = vrot.slane %v1514_v59, %v2583_v42 }
 0x346   : > { %v1317_v21 = vadd.f32 %v1316_v19, %v1307_v18 }
 0x348   : > { %v1327_v25 = vadd.f32 %v1326_v22, %v1317_v21 }
 0x34a   : > { %v1337_v32 = vadd.f32 %v1336_v24, %v1327_v25 }
 0x34c   : > { %v1347_v27 = vadd.f32 %v1346_v30, %v1337_v32 }
 0x34e   : > { %v1357_v39 = vadd.f32 %v1356_v35, %v1347_v27 }
 0x350   : > { %v1367_v45 = vadd.f32 %v1366_v37, %v1357_v39 }
 0x352   : > { %v1377_v48 = vadd.f32 %v1376_v28, %v1367_v45 }
 0x354   : > { %v1387_v52 = vadd.f32 %v1386_v33, %v1377_v48 }
 0x356   : > { %v1397_v51 = vadd.f32 %v1396_v47, %v1387_v52 }
 0x358   : > { %v1407_v54 = vadd.f32 %v1406_v38, %v1397_v51 }
 0x35a   : > { %v1408_v56 = vmul.f32 0.5, %v1407_v54 }
 0x35c   : > { %2100 = vtanh.f32 %v1408_v56 }
 0x366   : > { %v2101_v60 = vpop.eup %2100 }
 0x367   : > { %v1410_v53 = vadd.f32 1.0, %v2101_v60 }
 0x369   : > { %v1411_v62 = vmul.f32 0.5, %v1410_v53 }
 0x36b   : > { %v1442_v2 = vmul.f32 %v1441_v63, %v1411_v62  ;;  %v1432_v7 = vmul.f32 %v1431_v0, %v1411_v62  ;;  %v1455_v8 = vmul.f32 %v1454_v61, %v1411_v62  ;;  %v1520_v9 = vmul.f32 %v1519_v49, %v1411_v62 }
 0x36c   : > { %v1468_v5 = vmul.f32 %v1467_v4, %v1411_v62  ;;  %v1481_v13 = vmul.f32 %v1480_v6, %v1411_v62  ;;  %v1494_v19 = vmul.f32 %v1493_v12, %v1411_v62  ;;  %v1507_v21 = vmul.f32 %v1506_v15, %v1411_v62 }
 0x36d   : > { %v1444_v10 = vrot.slane %v1442_v2, 1  ;;  %v1433_v11 = vadd.f32 %v1432_v7, %v1422_v1  ;;  %v1457_v16 = vrot.slane %v1455_v8, 2  ;;  %v1522_v29 = vrot.slane %v1520_v9, 7 }
 0x36e   : > { %v1470_v17 = vrot.slane %v1468_v5, 3  ;;  %v1483_v20 = vrot.slane %v1481_v13, 4  ;;  %v1496_v24 = vrot.slane %v1494_v19, 5  ;;  %v1509_v25 = vrot.slane %v1507_v21, 6 }
 0x36f   : > { %v1446_v14 = vadd.f32 %v1444_v10, %v1433_v11 }
 0x371   : > { %v1459_v18 = vadd.f32 %v1457_v16, %v1446_v14 }
 0x373   : > { %v1472_v22 = vadd.f32 %v1470_v17, %v1459_v18 }
 0x375   : > { %v1485_v23 = vadd.f32 %v1483_v20, %v1472_v22 }
 0x377   : > { %v1498_v26 = vadd.f32 %v1496_v24, %v1485_v23 }
 0x379   : > { %v1511_v30 = vadd.f32 %v1509_v25, %v1498_v26 }
 0x37b   : > { %v1524_v31 = vadd.f32 %v1522_v29, %v1511_v30 }
 0x37d   : > { %v1525_v32 = vmul.f32 0.5, %v1524_v31 }
 0x37f   : > { %2102 = vtanh.f32 %v1525_v32 }
 0x389   : > { %v2103_v42 = vpop.eup %2102 }
 0x38a   : > { %v1527_v34 = vadd.f32 1.0, %v2103_v42 }
 0x38c   : > { %v1528_v27 = vmul.f32 0.5, %v1527_v34 }
 0x38e   : > { %1529 = vst [vmem:[%s475_s14] sm:$0x1] %v1528_v27 }
 0x38f   : > { %2117 = shalt.err (!%p2114_p3)
}
 0x390   : > { %s2118_s21 = scalar_lea.hbm %s2608_s17, 16  ;;  %s2122_s23 = scalar_lea.hbm %s2663_s13, 128 }
 0x391   : > { %p2119_p4 = scmp.ne.s32.totalorder %s2608_s17, %s2118_s21  ;;  %p2123_p9 = scmp.lt.u32.totalorder %s2608_s17, %s2663_s13 }
 0x392   : > { %p2124_p10 = scmp.lt.u32.totalorder %s2122_s23, %s2118_s21  ;;  %p2126_p12 = scmp.lt.u32.totalorder %s2118_s21, %s2608_s17 }
 0x393   : > { %p2120_p7 = pnand %p2119_p4, %p2293_p5 }
 0x394   : > { %p2125_p11 = por %p2124_p10, %p2123_p9 }
 0x395   : > { %p2121_p8 = pneg %p2120_p7 }
 0x396   : > { %p2127_p13 = por %p2126_p12, %p2125_p11 }
 0x398   : > { %p2128_p0 = pnand %p2127_p13, %p2121_p8 }
 0x39a   : > { %2131 = shalt.err (!%p2128_p0)
}
 0x39b   : > { %1990 = dma.vmem_to_hbm [thread:$0]  (%p2293_p5), %s2610_s16, 16, %s2608_s17, %s1531_s22  }
 0x39c PF: > { %p1996_p1 = scmp.ge.s32.totalorder %s2166_s30, 2  ;;  %s1555_s1 = sand.u32 1, %s2154_s27  }
 0x39d   : > { %s1556_s12 = scalar_lea.sflag [#allocation4], %s1555_s1 }
 0x39e   : > { %p1993_p2 = pnand %p1996_p1, %p2297_p6 }
 0x3a0   : > { %2149 = dma.done.wait (!%p1993_p2), %s1556_s12, 16  }
 0x3a1   : > { %2151 = vsyncadd (!%p1993_p2), %s1556_s12, 4294967280  ;;  %p25_p3 = scmp.ge.s32.totalorder %s2281_s15, 10   ;;  %s2672_s27 = smov %s2158_s28 }
 0x3a2   : > { %s2673_s28 = smov %s2162_s29  ;;  %s2674_s29 = smov %s2291_s18 }
 0x3a3   : > { %s2675_s30 = smov %s2281_s15  ;;  %27 = sbr.rel (!%p25_p3) target bundleno = 6 (0x6), region = 110 }
 0x3aa   :  { %1560 = vsyncpa [#allocation4], 1 }
 0x3ab   :  { %1562 = vsyncpa [#allocation4 + $0x1], 1 }

</bundles_post_ra>
